<compile_context>
chip_gen: v7x
topology: tpu7x:2x2x1
jax: 0.10.0
libtpu: 0.0.40
codegen_flags: <defaults>
</compile_context>

<pallas_src>
import jax
import jax.numpy as jnp
from jax.experimental import pallas as pl
from jax.experimental.pallas import tpu as pltpu

CLAMP_MIN = 1.0
CLAMP_MAX = 10.0


def _round_up(x, m):
    return ((x + m - 1) // m) * m


def _largest_divisor_leq(n, cap):
    for d in range(min(n, cap), 0, -1):
        if n % d == 0:
            return d
    return 1


def conv1x1_clamp_kernel(w_ref, b_ref, x_ref, o_ref):
    # w_ref: (Cout*Cin,) f32 SMEM scalars, b_ref: (Cout,) f32 SMEM scalars
    # x_ref: (nb, Cin, th, W) VMEM, o_ref: (nb, Cout, th, W) VMEM
    cin = x_ref.shape[1]
    cout = o_ref.shape[1]

    # Load each input channel once as a dense (nb, th, W) slab (selecting a
    # non-minor dim -> whole-tile selection, no relayout).
    # TODO(synk): for bf16 inputs on v6e/v7x this f32 upcast could be skipped.
    xs = [x_ref[:, c, :, :].astype(jnp.float32) for c in range(cin)]

    for o in range(cout):
        acc = xs[0] * w_ref[o * cin + 0]
        for c in range(1, cin):
            acc = acc + xs[c] * w_ref[o * cin + c]   # VPU FMA on dense slabs
        acc = acc + b_ref[o]
        acc = jnp.minimum(jnp.maximum(acc, CLAMP_MIN), CLAMP_MAX)
        # Direct per-channel store: plain dense vst, no concat/relayout.
        o_ref[:, o, :, :] = acc.astype(o_ref.dtype)


def conv1x1_clamp(x_nchw, weight, bias, *, vmem_budget_bytes=12 * 1024 * 1024):
    """x_nchw: (N, Cin, H, W); weight: (Cout, Cin, 1, 1); bias: (Cout,)."""
    N, Cin, H, W = x_nchw.shape
    Cout = weight.shape[0]
    itemsize = jnp.dtype(x_nchw.dtype).itemsize

    # VMEM cost model: in + out blocks, double-buffered, with lane/sublane
    # padding.  `unit` = padded bytes per (batch element, H-row).
    w_lanes = _round_up(W, 128)
    unit = 2 * (Cin + Cout) * w_lanes * itemsize
    max_rows = max(8, vmem_budget_bytes // unit)         # cap on nb * th_pad

    h_pad8 = _round_up(H, 8)
    if h_pad8 <= max_rows:
        # Whole image per block; fold batch elements in while they fit, but
        # keep >= 2 grid blocks when N >= 2 (v7x has 2 TensorCores) and make
        # nb divide N so there are no ragged blocks.
        th = H
        nb_cap = max(1, min(max_rows // h_pad8, N if N == 1 else N // 2))
        nb = _largest_divisor_leq(N, nb_cap)
    else:
        # Very large feature maps: tile the H axis in multiples of 8 rows.
        # A ragged last H-block is handled by Pallas (edge DMAs are clamped to
        # the array bounds, so out-of-bounds rows are never written back).
        nb = 1
        th = max(8, (max_rows // 8) * 8)                 # < H by construction

    grid = (pl.cdiv(N, nb), pl.cdiv(H, th))

    w_vec = weight.reshape(Cout * Cin).astype(jnp.float32)   # SMEM scalars
    b_vec = bias.reshape(Cout).astype(jnp.float32)           # SMEM scalars

    out = pl.pallas_call(
        conv1x1_clamp_kernel,
        out_shape=jax.ShapeDtypeStruct((N, Cout, H, W), x_nchw.dtype),
        grid_spec=pltpu.PrefetchScalarGridSpec(
            num_scalar_prefetch=0,
            grid=grid,
            in_specs=[
                pl.BlockSpec(memory_space=pltpu.MemorySpace.SMEM),       # weight
                pl.BlockSpec(memory_space=pltpu.MemorySpace.SMEM),       # bias
                pl.BlockSpec((nb, Cin, th, W), lambda n, h: (n, 0, h, 0)),
            ],
            out_specs=pl.BlockSpec((nb, Cout, th, W), lambda n, h: (n, 0, h, 0)),
        ),
        compiler_params=pltpu.CompilerParams(
            dimension_semantics=("parallel", "parallel"),
            vmem_limit_bytes=32 * 1024 * 1024,
        ),
    )(w_vec, b_vec, x_nchw)

    return out


if __name__ == "__main__":
    key = jax.random.PRNGKey(0)
    kx, kw, kb = jax.random.split(key, 3)

    # Small shapes consistent with the module (Conv2d(3, 3, 1)).
    N, Cin, H, W = 2, 3, 16, 16
    Cout = 3

    x = jax.random.normal(kx, (N, Cin, H, W), dtype=jnp.float32)
    # Deterministic parameter init (mimics PyTorch's U(-1/sqrt(fan_in), ...)).
    bound = 1.0 / (Cin ** 0.5)
    weight = jax.random.uniform(kw, (Cout, Cin, 1, 1), jnp.float32, -bound, bound)
    bias = jax.random.uniform(kb, (Cout,), jnp.float32, -bound, bound)

    out = conv1x1_clamp(x, weight, bias)
    out = jax.block_until_ready(out)

    # Reference check in plain JAX (1x1 conv == channel mix) + clamp.
    ref = jnp.einsum("nchw,oc->nohw", x, weight.reshape(Cout, Cin)) \
          + bias.reshape(1, Cout, 1, 1)
    ref = jnp.clip(ref, CLAMP_MIN, CLAMP_MAX)
    assert out.shape == (N, Cout, H, W)
    assert jnp.allclose(out, ref, atol=1e-5, rtol=1e-5)

    print("KERNEL_OK")
</pallas_src>

<mosaic_0001>
module attributes {stable_mosaic.version = 11 : i64} {
  func.func @conv1x1_clamp_kernel(%arg0: i32, %arg1: i32, %arg2: memref<9xf32, #tpu.memory_space<smem>>, %arg3: memref<3xf32, #tpu.memory_space<smem>>, %arg4: memref<1x3x16x16xf32, #tpu.memory_space<vmem>>, %arg5: memref<1x3x16x16xf32, #tpu.memory_space<vmem>>) attributes {dimension_semantics = [#tpu.dimension_semantics<parallel>, #tpu.dimension_semantics<parallel>], iteration_bounds = array<i64: 2, 1>, scalar_prefetch = 0 : i64, scratch_operands = 0 : i64, tpu.core_type = #tpu.core_type<tc>, window_params = [{transform_indices = @transform_0, window_bounds = array<i64: 9>}, {transform_indices = @transform_1, window_bounds = array<i64: 3>}, {transform_indices = @transform_2, window_bounds = array<i64: 1, 3, 16, 16>}, {transform_indices = @transform_3, window_bounds = array<i64: 1, 3, 16, 16>}]} {
    %c0 = arith.constant 0 : index
    %c0_0 = arith.constant 0 : index
    %c0_1 = arith.constant 0 : index
    %c0_2 = arith.constant 0 : index
    %0 = vector.load %arg4[%c0, %c0_0, %c0_1, %c0_2] : memref<1x3x16x16xf32, #tpu.memory_space<vmem>>, vector<1x1x16x16xf32>
    %1 = vector.shape_cast %0 : vector<1x1x16x16xf32> to vector<1x16x16xf32>
    %c0_3 = arith.constant 0 : index
    %c1 = arith.constant 1 : index
    %c0_4 = arith.constant 0 : index
    %c0_5 = arith.constant 0 : index
    %2 = vector.load %arg4[%c0_3, %c1, %c0_4, %c0_5] : memref<1x3x16x16xf32, #tpu.memory_space<vmem>>, vector<1x1x16x16xf32>
    %3 = vector.shape_cast %2 : vector<1x1x16x16xf32> to vector<1x16x16xf32>
    %c0_6 = arith.constant 0 : index
    %c2 = arith.constant 2 : index
    %c0_7 = arith.constant 0 : index
    %c0_8 = arith.constant 0 : index
    %4 = vector.load %arg4[%c0_6, %c2, %c0_7, %c0_8] : memref<1x3x16x16xf32, #tpu.memory_space<vmem>>, vector<1x1x16x16xf32>
    %5 = vector.shape_cast %4 : vector<1x1x16x16xf32> to vector<1x16x16xf32>
    %c0_9 = arith.constant 0 : index
    %6 = memref.load %arg2[%c0_9] : memref<9xf32, #tpu.memory_space<smem>>
    %7 = vector.broadcast %6 : f32 to vector<1x16x16xf32>
    %8 = arith.mulf %1, %7 : vector<1x16x16xf32>
    %c1_10 = arith.constant 1 : index
    %9 = memref.load %arg2[%c1_10] : memref<9xf32, #tpu.memory_space<smem>>
    %10 = vector.broadcast %9 : f32 to vector<1x16x16xf32>
    %11 = arith.mulf %3, %10 : vector<1x16x16xf32>
    %12 = arith.addf %8, %11 : vector<1x16x16xf32>
    %c2_11 = arith.constant 2 : index
    %13 = memref.load %arg2[%c2_11] : memref<9xf32, #tpu.memory_space<smem>>
    %14 = vector.broadcast %13 : f32 to vector<1x16x16xf32>
    %15 = arith.mulf %5, %14 : vector<1x16x16xf32>
    %16 = arith.addf %12, %15 : vector<1x16x16xf32>
    %c0_12 = arith.constant 0 : index
    %17 = memref.load %arg3[%c0_12] : memref<3xf32, #tpu.memory_space<smem>>
    %18 = vector.broadcast %17 : f32 to vector<1x16x16xf32>
    %19 = arith.addf %16, %18 : vector<1x16x16xf32>
    %cst = arith.constant 1.000000e+00 : f32
    %20 = vector.broadcast %cst : f32 to vector<1x16x16xf32>
    %21 = arith.maximumf %19, %20 : vector<1x16x16xf32>
    %cst_13 = arith.constant 1.000000e+01 : f32
    %22 = vector.broadcast %cst_13 : f32 to vector<1x16x16xf32>
    %23 = arith.minimumf %21, %22 : vector<1x16x16xf32>
    %c0_14 = arith.constant 0 : index
    %c0_15 = arith.constant 0 : index
    %c0_16 = arith.constant 0 : index
    %c0_17 = arith.constant 0 : index
    %24 = vector.load %arg5[%c0_14, %c0_15, %c0_16, %c0_17] : memref<1x3x16x16xf32, #tpu.memory_space<vmem>>, vector<1x1x16x16xf32>
    %25 = vector.shape_cast %24 : vector<1x1x16x16xf32> to vector<1x16x16xf32>
    %26 = vector.shape_cast %23 : vector<1x16x16xf32> to vector<1x1x16x16xf32>
    tpu.vector_store %arg5[%c0_14, %c0_15, %c0_16, %c0_17], %26 {strides = array<i32>} : memref<1x3x16x16xf32, #tpu.memory_space<vmem>>, vector<1x1x16x16xf32>,
    %c3 = arith.constant 3 : index
    %27 = memref.load %arg2[%c3] : memref<9xf32, #tpu.memory_space<smem>>
    %28 = vector.broadcast %27 : f32 to vector<1x16x16xf32>
    %29 = arith.mulf %1, %28 : vector<1x16x16xf32>
    %c4 = arith.constant 4 : index
    %30 = memref.load %arg2[%c4] : memref<9xf32, #tpu.memory_space<smem>>
    %31 = vector.broadcast %30 : f32 to vector<1x16x16xf32>
    %32 = arith.mulf %3, %31 : vector<1x16x16xf32>
    %33 = arith.addf %29, %32 : vector<1x16x16xf32>
    %c5 = arith.constant 5 : index
    %34 = memref.load %arg2[%c5] : memref<9xf32, #tpu.memory_space<smem>>
    %35 = vector.broadcast %34 : f32 to vector<1x16x16xf32>
    %36 = arith.mulf %5, %35 : vector<1x16x16xf32>
    %37 = arith.addf %33, %36 : vector<1x16x16xf32>
    %c1_18 = arith.constant 1 : index
    %38 = memref.load %arg3[%c1_18] : memref<3xf32, #tpu.memory_space<smem>>
    %39 = vector.broadcast %38 : f32 to vector<1x16x16xf32>
    %40 = arith.addf %37, %39 : vector<1x16x16xf32>
    %cst_19 = arith.constant 1.000000e+00 : f32
    %41 = vector.broadcast %cst_19 : f32 to vector<1x16x16xf32>
    %42 = arith.maximumf %40, %41 : vector<1x16x16xf32>
    %cst_20 = arith.constant 1.000000e+01 : f32
    %43 = vector.broadcast %cst_20 : f32 to vector<1x16x16xf32>
    %44 = arith.minimumf %42, %43 : vector<1x16x16xf32>
    %c0_21 = arith.constant 0 : index
    %c1_22 = arith.constant 1 : index
    %c0_23 = arith.constant 0 : index
    %c0_24 = arith.constant 0 : index
    %45 = vector.load %arg5[%c0_21, %c1_22, %c0_23, %c0_24] : memref<1x3x16x16xf32, #tpu.memory_space<vmem>>, vector<1x1x16x16xf32>
    %46 = vector.shape_cast %45 : vector<1x1x16x16xf32> to vector<1x16x16xf32>
    %47 = vector.shape_cast %44 : vector<1x16x16xf32> to vector<1x1x16x16xf32>
    tpu.vector_store %arg5[%c0_21, %c1_22, %c0_23, %c0_24], %47 {strides = array<i32>} : memref<1x3x16x16xf32, #tpu.memory_space<vmem>>, vector<1x1x16x16xf32>,
    %c6 = arith.constant 6 : index
    %48 = memref.load %arg2[%c6] : memref<9xf32, #tpu.memory_space<smem>>
    %49 = vector.broadcast %48 : f32 to vector<1x16x16xf32>
    %50 = arith.mulf %1, %49 : vector<1x16x16xf32>
    %c7 = arith.constant 7 : index
    %51 = memref.load %arg2[%c7] : memref<9xf32, #tpu.memory_space<smem>>
    %52 = vector.broadcast %51 : f32 to vector<1x16x16xf32>
    %53 = arith.mulf %3, %52 : vector<1x16x16xf32>
    %54 = arith.addf %50, %53 : vector<1x16x16xf32>
    %c8 = arith.constant 8 : index
    %55 = memref.load %arg2[%c8] : memref<9xf32, #tpu.memory_space<smem>>
    %56 = vector.broadcast %55 : f32 to vector<1x16x16xf32>
    %57 = arith.mulf %5, %56 : vector<1x16x16xf32>
    %58 = arith.addf %54, %57 : vector<1x16x16xf32>
    %c2_25 = arith.constant 2 : index
    %59 = memref.load %arg3[%c2_25] : memref<3xf32, #tpu.memory_space<smem>>
    %60 = vector.broadcast %59 : f32 to vector<1x16x16xf32>
    %61 = arith.addf %58, %60 : vector<1x16x16xf32>
    %cst_26 = arith.constant 1.000000e+00 : f32
    %62 = vector.broadcast %cst_26 : f32 to vector<1x16x16xf32>
    %63 = arith.maximumf %61, %62 : vector<1x16x16xf32>
    %cst_27 = arith.constant 1.000000e+01 : f32
    %64 = vector.broadcast %cst_27 : f32 to vector<1x16x16xf32>
    %65 = arith.minimumf %63, %64 : vector<1x16x16xf32>
    %c0_28 = arith.constant 0 : index
    %c2_29 = arith.constant 2 : index
    %c0_30 = arith.constant 0 : index
    %c0_31 = arith.constant 0 : index
    %66 = vector.load %arg5[%c0_28, %c2_29, %c0_30, %c0_31] : memref<1x3x16x16xf32, #tpu.memory_space<vmem>>, vector<1x1x16x16xf32>
    %67 = vector.shape_cast %66 : vector<1x1x16x16xf32> to vector<1x16x16xf32>
    %68 = vector.shape_cast %65 : vector<1x16x16xf32> to vector<1x1x16x16xf32>
    tpu.vector_store %arg5[%c0_28, %c2_29, %c0_30, %c0_31], %68 {strides = array<i32>} : memref<1x3x16x16xf32, #tpu.memory_space<vmem>>, vector<1x1x16x16xf32>,
    return
  }
  func.func @transform_0(%arg0: i32, %arg1: i32) -> i32 {
    %c0_i32 = arith.constant 0 : i32
    %c0_i32_0 = arith.constant 0 : i32
    return %c0_i32 : i32
  }
  func.func @transform_1(%arg0: i32, %arg1: i32) -> i32 {
    %c0_i32 = arith.constant 0 : i32
    %c0_i32_0 = arith.constant 0 : i32
    return %c0_i32 : i32
  }
  func.func @transform_2(%arg0: i32, %arg1: i32) -> (i32, i32, i32, i32) {
    %c0_i32 = arith.constant 0 : i32
    %c0_i32_0 = arith.constant 0 : i32
    %c0_i32_1 = arith.constant 0 : i32
    return %arg0, %c0_i32, %arg1, %c0_i32_0 : i32, i32, i32, i32
  }
  func.func @transform_3(%arg0: i32, %arg1: i32) -> (i32, i32, i32, i32) {
    %c0_i32 = arith.constant 0 : i32
    %c0_i32_0 = arith.constant 0 : i32
    %c0_i32_1 = arith.constant 0 : i32
    return %arg0, %c0_i32, %arg1, %c0_i32_0 : i32, i32, i32, i32
  }
}

</mosaic_0001>

<bundles_post_ra>
// kernel: tpu_custom_call.1
= control target key start
LH: loop header
LB: loop body
LE: loop exit
PB: predicated region body
PF: predicated region fallthrough
CT: control target
= control target key end

     0   :  { %8 = vsyncpa [#allocation5], 0  ;;  %s1009_s0 = inlined_call_operand.hbm [shape: f32[9], index: 0, kind: input, shape index: {}]   ;;  %s1010_s1 = inlined_call_operand.vmem [shape: f32[3], index: 1, kind: input, shape index: {}]   ;;  %s1011_s2 = inlined_call_operand.hbm [shape: f32[2,3,16,16], index: 2, kind: input, shape index: {}]   ;;  %s1012_s3 = inlined_call_operand.hbm [shape: f32[2,3,16,16], index: 3, kind: output, shape index: {}]  }
   0x1   :  { %9 = vsyncpa [#allocation6], 0 }
   0x2   :  { %10 = vsyncpa [#allocation3], 0 }
   0x3   :  { %12 = vsyncpa [#allocation3 + $0x1], 0 }
   0x4   :  { %13 = vsyncpa [#allocation4], 0 }
   0x5   :  { %15 = vsyncpa [#allocation4 + $0x1], 0  ;;  %s750_s12 = smov 0   ;;  %s752_s13 = smov 0  }
   0x6   :  { %s754_s14 = smov 0   ;;  %s756_s15 = smov 0  }
   0x7   :  { %s758_s16 = smov 0   ;;  %s760_s17 = smov 0  }
   0x8 LB: > { %s450_s18 = sadd.s32 4294967295, %s720_s17   ;;  %s451_s19 = sadd.s32 4294967294, %s720_s17   ;;  %s720_s17 = sphi %s760_s17, %s21_s17   ;;  %s716_s16 = sphi %s758_s16, %s1033_s16   ;;  %s712_s15 = sphi %s756_s15, %s1032_s15   ;;  %s708_s14 = sphi %s754_s14, %s1031_s14   ;;  %s704_s13 = sphi %s752_s13, %s1030_s13   ;;  %s700_s12 = sphi %s750_s12, %s1029_s12  }
   0x9   : > { %s84_s20 = sadd.s32 1, %s708_s14  ;;  %p91_p0 = scmp.ne.s32.totalorder %s708_s14, %s704_s13 }
   0xa   : > { %p92_p1 = scmp.eq.s32.totalorder %s720_s17, 0  ;;  %p97_p2 = scmp.ne.s32.totalorder %s704_s13, %s700_s12 }
   0xb   : > { %p788_p3 = scmp.eq.s32.totalorder %s450_s18, 0  ;;  %p123_p4 = scmp.eq.s32.totalorder %s450_s18, 1 }
   0xc   : > { %p93_p5 = por %p92_p1, %p91_p0  ;;  %p129_p6 = scmp.eq.s32.totalorder %s451_s19, 1 }
   0xd   : > { %s1017_s21 = scalar_select %p788_p3, 1, 0 }
   0xe   : > { %p794_p7 = por %p788_p3, %p97_p2  ;;  %p798_p8 = por %p123_p4, %p91_p0 }
   0xf   : > { %p802_p9 = por %p129_p6, %p97_p2  ;;  %p452_p10 = scmp.ge.s32.totalorder %s720_s17, 1 }
  0x10   : > { %s1018_s22 = scalar_select %p794_p7, 1, 0 }
  0x11   : > { %s1019_s23 = scalar_select %p798_p8, 1, 0 }
  0x12   : > { %s1020_s24 = scalar_select %p802_p9, 1, 0 }
  0x13   : > { %p136_p11 = scmp.lt.s32.totalorder %s720_s17, 3  ;;  %p514_p1 = scmp.lt.s32.totalorder %s720_s17, 2 }
  0x14   : > { %s158_s28 = sshll.u32 %s1010_s1, 4  ;;  %s169_s4 = sand.u32 1, %s708_s14   ;;  %s159_s28 = int_to_ptr.vmem [resolvable:$true] %s158_s28 }
  0x15   : > { %p809_p13 = pnand %p452_p10, %p136_p11  ;;  %p819_p4 = pnand %p514_p1, %p93_p5 }
  0x16   : > { %s33_s5 = sadd.s32 1, %s716_s16  ;;  %s572_s8 = scalar_lea.hbm %s1009_s0, 16 }
  0x17   : > { %p497_p0 = pneg %p809_p13  ;;  %p573_p5 = scmp.ne.s32.totalorder %s1009_s0, %s572_s8 }
  0x18   : > { %p579_p1 = scmp.lt.u32.totalorder %s572_s8, %s1009_s0 }
  0x19   : > { %p825_p2 = pnand %p497_p0, %p788_p3 }
  0x1b   : > { %p574_p6 = pneg %p825_p2 }
  0x1d   : > { %p575_p10 = pnand %p574_p6, %p573_p5 }
  0x1f   : > { %p576_p11 = pneg %p575_p10 }
  0x21   : > { %p581_p0 = pnand %p579_p1, %p576_p11 }
  0x23   : > { %584 = shalt.err (!%p581_p0)
}
  0x24   : > { %s722_s19 = smov [#allocation2]   ;;  %s585_s6 = scalar_lea.vmem %s159_s28, 16 }
  0x25   : > { %500 = dma.hbm_to_smem (!%p825_p2), %s1009_s0, 16, %s722_s19, [#allocation5]  }
  0x26   : > { %p586_p12 = scmp.ne.s32.totalorder %s159_s28, %s585_s6  ;;  %p593_p7 = scmp.lt.s32.totalorder %s159_s28, %s159_s28 }
  0x27   : > { %p594_p5 = scmp.lt.s32.totalorder %s585_s6, %s585_s6 }
  0x28   : > { %p588_p9 = pnand %p586_p12, %p574_p6 }
  0x29   : > { %p595_p10 = por %p594_p5, %p593_p7 }
  0x2a   : > { %p589_p8 = pneg %p588_p9 }
  0x2c   : > { %p596_p3 = pnand %p595_p10, %p589_p8 }
  0x2e   : > { %599 = shalt.err (!%p596_p3)
}
  0x2f   : > { %s723_s7 = smov [#allocation7]   ;;  %p35_p11 = scmp.ge.s32.totalorder %s33_s5, 2 }
  0x30   : > { %503 = dma.vmem_to_smem (!%p825_p2), %s159_s28, 16, %s723_s7, [#allocation6]  }
  0x31   : > { %s481_s8 = smul.u32 48, %s169_s4  ;;  %s1035_s5 = smov (%p35_p11, %s33_s5), 0 }
  0x32   : > { %s482_s9 = smul.u32 768, %s716_s16  ;;  %s79_s10 = ssub.s32 %s716_s16, %s1035_s5 }
  0x33   : > { %s173_s11 = scalar_lea.vmem [#allocation8], %s481_s8  ;;  %p82_p3 = scmp.eq.s32.totalorder %s79_s10, 0 }
  0x34   : > { %s182_s18 = sshll.u32 %s173_s11, 4  ;;  %s859_s26 = scalar_lea.hbm %s1011_s2, %s482_s9  ;;  %s861_s18 = int_to_ptr.vmem [resolvable:$true] %s182_s18 }
  0x35   : > { %s866_s28 = scalar_select %p82_p3, %s708_s14, %s84_s20  }
  0x36   : > { %s870_s27 = scalar_lea.sflag [#allocation3], %s169_s4  ;;  %s600_s6 = scalar_lea.hbm %s859_s26, 768 }
  0x37   : > { %p601_p7 = scmp.ne.s32.totalorder %s859_s26, %s600_s6  ;;  %p602_p8 = pneg %p819_p4 }
  0x38   : > { %s605_s9 = scalar_lea.hbm %s1011_s2, 1536  ;;  %p606_p2 = scmp.lt.u32.totalorder %s859_s26, %s1011_s2 }
  0x39   : > { %p603_p9 = pnand %p602_p8, %p601_p7  ;;  %p607_p6 = scmp.lt.u32.totalorder %s605_s9, %s600_s6 }
  0x3a   : > { %p609_p0 = scmp.lt.u32.totalorder %s600_s6, %s859_s26 }
  0x3b   : > { %p604_p12 = pneg %p603_p9  ;;  %p608_p1 = por %p607_p6, %p606_p2 }
  0x3d   : > { %p610_p5 = por %p609_p0, %p608_p1 }
  0x3f   : > { %p611_p10 = pnand %p610_p5, %p604_p12 }
  0x41   : > { %614 = shalt.err (!%p611_p10)
}
  0x42   : > { %s615_s20 = scalar_lea.vmem %s861_s18, 768  ;;  %s724_s4 = smov [#allocation8]  }
  0x43   : > { %p616_p11 = scmp.ne.s32.totalorder %s861_s18, %s615_s20  ;;  %s620_s30 = sshll.u32 %s724_s4, 4  ;;  %s621_s30 = int_to_ptr.vmem [resolvable:$false] %s620_s30 }
  0x44   : > { %s622_s19 = scalar_lea.vmem %s621_s30, 1536  ;;  %p623_p9 = scmp.lt.s32.totalorder %s861_s18, %s621_s30 }
  0x45   : > { %p618_p3 = pnand %p616_p11, %p602_p8  ;;  %p624_p2 = scmp.lt.s32.totalorder %s622_s19, %s615_s20 }
  0x47   : > { %p619_p7 = pneg %p618_p3  ;;  %p625_p6 = por %p624_p2, %p623_p9 }
  0x49   : > { %p626_p1 = pnand %p625_p6, %p619_p7 }
  0x4b   : > { %629 = shalt.err (!%p626_p1)
}
  0x4c   : > { %s725_s6 = smov 128   ;;  %s726_s7 = smov 8  }
  0x4d   : > { %507 = dma.hbm_to_vmem [thread:$0]  (!%p819_p4), %s859_s26, 768, %s861_s18, %s870_s27, %s725_s6, %s725_s6, %s726_s7  }
  0x4e   : > { %194 = sbr.rel (%p809_p13) target bundleno = 139 (0x8b), region = 32  ;;  %p1024_p8 = scmp.ne.s32.totalorder (!%p809_p13), %s1017_s21, 0 }
  0x55   : > { %683 = dma.done.wait (%p1024_p8), [#allocation5], 16  }
  0x56   : > { %685 = vsyncadd (%p1024_p8), [#allocation5], 4294967280 }
  0x57   : > { %687 = dma.done.wait (%p1024_p8), [#allocation6], 16  }
  0x58   : > { %689 = vsyncadd (%p1024_p8), [#allocation6], 4294967280  ;;  %s909_s8 = sand.u32 1, %s704_s13   ;;  %p1025_p13 = scmp.ne.s32.totalorder %s1018_s22, 0 }
  0x59   : > { %s483_s25 = smul.u32 48, %s909_s8  ;;  %s205_s29 = scalar_lea.sflag [#allocation3], %s909_s8 }
  0x5b   : > { %s208_s18 = scalar_lea.vmem [#allocation8], %s483_s25 }
  0x5c   : > { %691 = dma.done.wait (%p1025_p13), %s205_s29, 768  }
  0x5d   : > { %693 = vsyncadd (%p1025_p13), %s205_s29, 4294966528 }
  0x5e   : > { %213 = sfence }
  0x5f   : > { %s242_s26 = sld [smem:[#allocation2]]  ;;  %s464_s21 = sld [smem:[#allocation2 + $0x1]]  ;;  %v234_v0 = vld [vmem:[%s208_s18] sm:$0xff]  ;;  %v460_v1 = vld [vmem:[%s208_s18 + $0x10] sm:$0xff]  ;;  %v235_v2 = vld [vmem:[%s208_s18 + $0x8] sm:$0xff]  ;;  %vm266_vm0 = vcmask 130048  }
  0x60   : > { %s465_s27 = sld [smem:[#allocation2 + $0x2]]  ;;  %s919_s9 = sld [smem:[#allocation7]]  ;;  %v462_v3 = vld [vmem:[%s208_s18 + $0x20] sm:$0xff]  ;;  %v461_v4 = vld [vmem:[%s208_s18 + $0x18] sm:$0xff]  ;;  %v463_v6 = vld [vmem:[%s208_s18 + $0x28] sm:$0xff] }
  0x61   : > { %s921_s10 = sld [smem:[#allocation2 + $0x3]]  ;;  %s923_s11 = sld [smem:[#allocation2 + $0x4]] }
  0x62   : > { %s925_s20 = sld [smem:[#allocation2 + $0x5]]  ;;  %s927_s22 = sld [smem:[#allocation7 + $0x1]] }
  0x63   : > { %s929_s4 = sld [smem:[#allocation2 + $0x6]]  ;;  %s931_s30 = sld [smem:[#allocation2 + $0x7]] }
  0x64   : > { %s933_s19 = sld [smem:[#allocation2 + $0x8]]  ;;  %s935_s6 = sld [smem:[#allocation7 + $0x2]] }
  0x65   : > { %v243_v5 = vstv %s242_s26  ;;  %v247_v8 = vstv %s464_s21  ;;  %s231_s7 = scalar_lea.vmem [#allocation9], %s483_s25  ;;  %s484_s18 = smul.u32 768, %s712_s15 }
  0x66   : > { %v244_v7 = vmul.f32 %v243_v5, %v234_v0  ;;  %v253_v9 = vstv %s465_s27  ;;  %v245_v10 = vmul.f32 %v243_v5, %v235_v2  ;;  %v248_v11 = vmul.f32 %v460_v1, %v247_v8  ;;  %s339_s29 = sshll.u32 %s231_s7, 4  ;;  %s324_s15 = scalar_lea.sflag [#allocation4], %s909_s8  ;;  %s953_s29 = int_to_ptr.vmem [resolvable:$true] %s339_s29 }
  0x67   : > { %v254_v12 = vmul.f32 %v462_v3, %v253_v9  ;;  %v249_v13 = vmul.f32 %v461_v4, %v247_v8  ;;  %v259_v14 = vstv %s919_s9  ;;  %v255_v15 = vmul.f32 %v463_v6, %v253_v9  ;;  %s959_s21 = scalar_lea.hbm %s1012_s3, %s484_s18  ;;  %s630_s27 = scalar_lea.vmem %s953_s29, 768 }
  0x68   : > { %v270_v16 = vstv %s921_s10  ;;  %v250_v17 = vadd.f32 %v248_v11, %v244_v7  ;;  %v274_v20 = vstv %s923_s11  ;;  %v280_v22 = vstv %s925_s20  ;;  %p631_p4 = scmp.ne.s32.totalorder %s953_s29, %s630_s27  ;;  %p1026_p12 = scmp.ne.s32.totalorder %s1019_s23, 0 }
  0x69   : > { %v251_v18 = vadd.f32 %v249_v13, %v245_v10  ;;  %v271_v19 = vmul.f32 %v270_v16, %v234_v0  ;;  %v275_v21 = vmul.f32 %v460_v1, %v274_v20  ;;  %v286_v23 = vstv %s927_s22  ;;  %s727_s9 = smov [#allocation9]  }
  0x6a   : > { %v272_v24 = vmul.f32 %v270_v16, %v235_v2  ;;  %v256_v25 = vadd.f32 %v254_v12, %v250_v17  ;;  %v281_v27 = vmul.f32 %v462_v3, %v280_v22  ;;  %v276_v28 = vmul.f32 %v461_v4, %v274_v20  ;;  %p632_p0 = pnand %p631_p4, %p1026_p12  ;;  %s634_s10 = sshll.u32 %s727_s9, 4  ;;  %s635_s10 = int_to_ptr.vmem [resolvable:$false] %s634_s10 }
  0x6b   : > { %v257_v26 = vadd.f32 %v255_v15, %v251_v18  ;;  %v277_v29 = vadd.f32 %v275_v21, %v271_v19  ;;  %v282_v30 = vmul.f32 %v463_v6, %v280_v22  ;;  %v297_v31 = vstv %s929_s4  ;;  %s636_s11 = scalar_lea.vmem %s635_s10, 1536  ;;  %p637_p10 = scmp.lt.s32.totalorder %s953_s29, %s635_s10 }
  0x6c   : > { %v301_v32 = vstv %s931_s30  ;;  %v260_v33 = vadd.f32 %v259_v14, %v256_v25  ;;  %v278_v35 = vadd.f32 %v276_v28, %v272_v24  ;;  %v298_v36 = vmul.f32 %v297_v31, %v234_v0  ;;  %p633_p5 = pneg %p632_p0  ;;  %p638_p11 = scmp.lt.s32.totalorder %s636_s11, %s630_s27 }
  0x6d   : > { %v261_v34 = vadd.f32 %v259_v14, %v257_v26  ;;  %v283_v37 = vadd.f32 %v281_v27, %v277_v29  ;;  %v302_v38 = vmul.f32 %v460_v1, %v301_v32  ;;  %v307_v39 = vstv %s933_s19 }
  0x6e   : > { %v313_v40 = vstv %s935_s6  ;;  %v262_v41 = vmax.f32 %v260_v33, 1.0  ;;  %v284_v43 = vadd.f32 %v282_v30, %v278_v35  ;;  %v308_v44 = vmul.f32 %v462_v3, %v307_v39  ;;  %p639_p3 = por %p638_p11, %p637_p10 }
  0x6f   : > { %v263_v42 = vmax.f32 %v261_v34, 1.0  ;;  %v287_v45 = vadd.f32 %v286_v23, %v283_v37  ;;  %v304_v46 = vadd.f32 %v302_v38, %v298_v36  ;;  %v299_v47 = vmul.f32 %v297_v31, %v235_v2 }
  0x70   : > { %v303_v48 = vmul.f32 %v461_v4, %v301_v32  ;;  %v264_v49 = vmin.f32 %v262_v41, 10.0  ;;  %v288_v51 = vadd.f32 %v286_v23, %v284_v43  ;;  %v309_v52 = vmul.f32 %v463_v6, %v307_v39  ;;  %p640_p7 = pnand %p639_p3, %p633_p5 }
  0x71   : > { %v265_v50 = vmin.f32 %v263_v42, 10.0  ;;  %v289_v53 = vmax.f32 %v287_v45, 1.0  ;;  %v310_v54 = vadd.f32 %v308_v44, %v304_v46 }
  0x72   : > { %v305_v55 = vadd.f32 %v303_v48, %v299_v47  ;;  %267 = vst.msk [vmem:[%s231_s7] sm:$0xff] %vm266_vm0, %v264_v49  ;;  %v290_v56 = vmax.f32 %v288_v51, 1.0 }
  0x73   : > { %268 = vst.msk [vmem:[%s231_s7 + $0x8] sm:$0xff] %vm266_vm0, %v265_v50  ;;  %v291_v57 = vmin.f32 %v289_v53, 10.0  ;;  %v314_v58 = vadd.f32 %v313_v40, %v310_v54 }
  0x74   : > { %v311_v59 = vadd.f32 %v309_v52, %v305_v55  ;;  %v292_v60 = vmin.f32 %v290_v56, 10.0 }
  0x75   : > { %470 = vst.msk [vmem:[%s231_s7 + $0x10] sm:$0xff] %vm266_vm0, %v291_v57  ;;  %v316_v61 = vmax.f32 %v314_v58, 1.0 }
  0x76   : > { %v315_v62 = vadd.f32 %v313_v40, %v311_v59  ;;  %471 = vst.msk [vmem:[%s231_s7 + $0x18] sm:$0xff] %vm266_vm0, %v292_v60 }
  0x77   : > { %v318_v63 = vmin.f32 %v316_v61, 10.0 }
  0x78   : > { %v317_v0 = vmax.f32 %v315_v62, 1.0 }
  0x79   : > { %476 = vst.msk [vmem:[%s231_s7 + $0x20] sm:$0xff] %vm266_vm0, %v318_v63 }
  0x7a   : > { %v319_v1 = vmin.f32 %v317_v0, 10.0 }
  0x7c   : > { %477 = vst.msk [vmem:[%s231_s7 + $0x28] sm:$0xff] %vm266_vm0, %v319_v1 }
  0x7d   : > { %643 = shalt.err (!%p640_p7)
}
  0x7e   : > { %s644_s20 = scalar_lea.hbm %s959_s21, 768  ;;  %s648_s30 = scalar_lea.hbm %s1012_s3, 1536 }
  0x7f   : > { %p645_p9 = scmp.ne.s32.totalorder %s959_s21, %s644_s20  ;;  %p649_p1 = scmp.lt.u32.totalorder %s959_s21, %s1012_s3 }
  0x80   : > { %p650_p8 = scmp.lt.u32.totalorder %s648_s30, %s644_s20  ;;  %p652_p4 = scmp.lt.u32.totalorder %s644_s20, %s959_s21 }
  0x81   : > { %p646_p2 = pnand %p645_p9, %p1026_p12 }
  0x82   : > { %p651_p13 = por %p650_p8, %p649_p1 }
  0x83   : > { %p647_p6 = pneg %p646_p2 }
  0x84   : > { %p653_p0 = por %p652_p4, %p651_p13 }
  0x86   : > { %p654_p5 = pnand %p653_p0, %p647_p6 }
  0x88   : > { %657 = shalt.err (!%p654_p5)
}
  0x89   : > { %s728_s7 = smov 128   ;;  %s729_s18 = smov 8  }
  0x8a   : > { %495 = dma.vmem_to_hbm [thread:$0]  (%p1026_p12), %s953_s29, 768, %s959_s21, %s324_s15, %s728_s7, %s728_s7, %s729_s18  }
  0x8b PF: > { %s354_s25 = sand.u32 1, %s700_s12   ;;  %p1027_p10 = scmp.ne.s32.totalorder %s1020_s24, 0 }
  0x8c   : > { %p1028_p11 = scmp.ge.s32.totalorder %s720_s17, 2  ;;  %s355_s26 = scalar_lea.sflag [#allocation4], %s354_s25 }
  0x8e   : > { %p509_p3 = pnand %p1028_p11, %p1027_p10 }
  0x90   : > { %695 = dma.done.wait (!%p509_p3), %s355_s26, 768  }
  0x91   : > { %697 = vsyncadd (!%p509_p3), %s355_s26, 4294966528  ;;  %s21_s17 = sadd.s32 1, %s720_s17   ;;  %s1029_s12 = smov %s704_s13 }
  0x92   : > { %p18_p7 = scmp.ge.s32.totalorder %s21_s17, 4   ;;  %s1030_s13 = smov %s708_s14 }
  0x93   : > { %s1031_s14 = smov %s866_s28  ;;  %s1032_s15 = smov %s716_s16 }
  0x94   : > { %s1033_s16 = smov %s1035_s5  ;;  %20 = sbr.rel (!%p18_p7) target bundleno = 8 (0x8), region = 91 }
  0x9b   :  { %360 = vsyncpa [#allocation3], 1 }
  0x9c   :  { %362 = vsyncpa [#allocation3 + $0x1], 1 }
  0x9d   :  { %363 = vsyncpa [#allocation4], 1 }
  0x9e   :  { %365 = vsyncpa [#allocation4 + $0x1], 1 }
  0x9f   :  { %366 = vsyncpa [#allocation5], 1 }
  0xa0   :  { %368 = vsyncpa [#allocation5 + $0x1], 1 }
  0xa1   :  { %369 = vsyncpa [#allocation6], 1 }
  0xa2   :  { %371 = vsyncpa [#allocation6 + $0x1], 1 }

</bundles_post_ra>
